<compile_context>
chip_gen: v6e
topology: v6e:2x2x1
jax: 0.10.0
libtpu: 0.0.40
codegen_flags: <defaults>
</compile_context>

<pallas_src>
import functools

import jax
import jax.numpy as jnp
from jax.experimental import pallas as pl
from jax.experimental.pallas import tpu as pltpu

_LANE = 128


def linear_prober_kernel(x_ref, w_ref, b_ref, o_ref, acc_ref):
    """One (i, k) grid step: accumulate x_tile @ w_tile, add bias at the end."""
    k = pl.program_id(1)

    @pl.when(k == 0)
    def _():
        acc_ref[...] = jnp.zeros_like(acc_ref)

    # MXU matmul with f32 accumulation (inputs may be f32 or bf16).
    acc_ref[...] += jnp.dot(
        x_ref[...], w_ref[...], preferred_element_type=jnp.float32
    )

    @pl.when(k == pl.num_programs(1) - 1)
    def _():
        o_ref[...] = (acc_ref[...] + b_ref[...]).astype(o_ref.dtype)


@functools.partial(jax.jit, static_argnames=("tm", "tk", "compute_dtype", "out_dtype"))
def linear_prober(x, w, b, *, tm=None, tk=None, compute_dtype=None, out_dtype=None):
    """y = x @ w + b, with x:[M,K], w:[K,N], b:[N] -> y:[M,N]."""
    M, K = x.shape
    K2, N = w.shape
    assert K == K2 and b.shape == (N,)

    out_dtype = out_dtype or x.dtype

    if compute_dtype is not None:
        x = x.astype(compute_dtype)
        w = w.astype(compute_dtype)

    # ---- Lane-dense N: pad out_features up to a multiple of 128. ----
    n_pad = max(_LANE, ((N + _LANE - 1) // _LANE) * _LANE)
    if n_pad != N:
        w = jnp.pad(w, ((0, 0), (0, n_pad - N)))
        b = jnp.pad(b, (0, n_pad - N))
    b2d = b.reshape(1, n_pad).astype(jnp.float32)

    # ---- K tiling: single block for modest K, else tile (zero-pad K). ----
    if tk is None:
        tk = K if K <= 1024 else 512
    k_pad = ((K + tk - 1) // tk) * tk
    if k_pad != K:
        # Zero padding keeps the accumulation exact for the tail K block.
        x = jnp.pad(x, ((0, 0), (0, k_pad - K)))
        w = jnp.pad(w, ((0, k_pad - K), (0, 0)))

    # ---- M tiling: multiple of 8 rows, capped so big M pipelines over >=2 steps. ----
    if tm is None:
        tm = min(512, ((M + 7) // 8) * 8)
    tm = max(8, (tm // 8) * 8)

    grid = (pl.cdiv(M, tm), k_pad // tk)

    # ---- Explicit VMEM budget (double-buffered x/w/out tiles + f32 acc + bias),
    #      clamped to stay well inside v7x's 64 MiB. ----
    in_bytes = jnp.dtype(x.dtype).itemsize
    out_bytes = jnp.dtype(out_dtype).itemsize
    vmem_bytes = (
        2 * tm * tk * in_bytes        # x tiles (double buffered)
        + 2 * tk * n_pad * in_bytes   # w tiles (double buffered)
        + 2 * tm * n_pad * out_bytes  # out tiles (double buffered)
        + tm * n_pad * 4              # f32 accumulator scratch
        + 2 * n_pad * 4               # bias
        + (1 << 20)                   # headroom
    )
    vmem_bytes = int(min(max(vmem_bytes, 4 << 20), 100 << 20))

    cost = pl.CostEstimate(
        flops=2 * M * k_pad * n_pad,
        transcendentals=0,
        bytes_accessed=(M * k_pad + k_pad * n_pad + n_pad) * in_bytes
        + M * n_pad * out_bytes,
    )

    y_pad = pl.pallas_call(
        linear_prober_kernel,
        out_shape=jax.ShapeDtypeStruct((M, n_pad), out_dtype),
        grid_spec=pltpu.PrefetchScalarGridSpec(
            num_scalar_prefetch=0,
            grid=grid,
            in_specs=[
                pl.BlockSpec((tm, tk), lambda i, k: (i, k)),      # x tile
                pl.BlockSpec((tk, n_pad), lambda i, k: (k, 0)),   # w tile
                pl.BlockSpec((1, n_pad), lambda i, k: (0, 0)),    # bias row
            ],
            out_specs=pl.BlockSpec((tm, n_pad), lambda i, k: (i, 0)),
            scratch_shapes=[pltpu.VMEM((tm, n_pad), jnp.float32)],
        ),
        compiler_params=pltpu.CompilerParams(
            dimension_semantics=("parallel", "arbitrary"),
            vmem_limit_bytes=vmem_bytes,
        ),
        cost_estimate=cost,
    )(x, w, b2d)

    return y_pad[:, :N] if n_pad != N else y_pad


if __name__ == "__main__":
    # Small shapes consistent with the module: batch of 8 vectors, in_dim=32, out_features=16.
    # TODO(synk): at this toy size the launch overhead dominates; in production either batch
    # many probe rows / heads into one call or let XLA fuse a plain jnp.dot instead.
    M, in_dim, out_features = 8, 32, 16

    key = jax.random.PRNGKey(0)
    kx, kw, kb = jax.random.split(key, 3)

    # Deterministic parameter init (mimics nn.Linear's uniform(-1/sqrt(in_dim), 1/sqrt(in_dim))).
    bound = 1.0 / jnp.sqrt(jnp.float32(in_dim))
    x = jax.random.normal(kx, (M, in_dim), dtype=jnp.float32)
    w = jax.random.uniform(kw, (in_dim, out_features), dtype=jnp.float32,
                           minval=-bound, maxval=bound)
    b = jax.random.uniform(kb, (out_features,), dtype=jnp.float32,
                           minval=-bound, maxval=bound)

    y_ref = x @ w + b

    # f32 path (exact check).
    y = linear_prober(x, w, b)
    jax.block_until_ready(y)
    assert y.shape == (M, out_features)
    assert jnp.allclose(y, y_ref, atol=1e-5, rtol=1e-5)

    # bf16 compute path (memory-bound fast path), looser tolerance.
    y_bf16 = linear_prober(x, w, b, compute_dtype=jnp.bfloat16, out_dtype=jnp.float32)
    jax.block_until_ready(y_bf16)
    assert jnp.allclose(y_bf16, y_ref, atol=3e-2, rtol=3e-2)

    print("KERNEL_OK")
</pallas_src>

<mosaic_0001>
module attributes {stable_mosaic.version = 11 : i64} {
  func.func @linear_prober_kernel(%arg0: i32, %arg1: i32, %arg2: memref<8x32xf32, #tpu.memory_space<vmem>>, %arg3: memref<32x128xf32, #tpu.memory_space<vmem>>, %arg4: memref<1x128xf32, #tpu.memory_space<vmem>>, %arg5: memref<8x128xf32, #tpu.memory_space<vmem>>, %arg6: memref<8x128xf32, #tpu.memory_space<vmem>>) attributes {dimension_semantics = [#tpu.dimension_semantics<parallel>, #tpu.dimension_semantics<arbitrary>], iteration_bounds = array<i64: 1, 1>, scalar_prefetch = 0 : i64, scratch_operands = 1 : i64, tpu.core_type = #tpu.core_type<tc>, window_params = [{transform_indices = @transform_0, window_bounds = array<i64: 8, 32>}, {transform_indices = @transform_1, window_bounds = array<i64: 32, 128>}, {pipeline_mode = #tpu.pipeline_mode<synchronous>, transform_indices = @transform_2, window_bounds = array<i64: 1, 128>}, {transform_indices = @transform_3, window_bounds = array<i64: 8, 128>}]} {
    %c0_i32 = arith.constant 0 : i32
    %0 = arith.cmpi eq, %arg1, %c0_i32 : i32
    %1 = arith.extui %0 : i1 to i32
    %c0_i32_0 = arith.constant 0 : i32
    %2 = arith.cmpi ne, %1, %c0_i32_0 : i32
    scf.if %2 {
      %cst_10 = arith.constant 0.000000e+00 : f32
      %12 = vector.broadcast %cst_10 : f32 to vector<8x128xf32>
      %c0_11 = arith.constant 0 : index
      %c0_12 = arith.constant 0 : index
      %13 = vector.load %arg6[%c0_11, %c0_12] : memref<8x128xf32, #tpu.memory_space<vmem>>, vector<8x128xf32>
      tpu.vector_store %arg6[%c0_11, %c0_12], %12 {strides = array<i32>} : memref<8x128xf32, #tpu.memory_space<vmem>>, vector<8x128xf32>,
    } else {
    }
    %c0 = arith.constant 0 : index
    %c0_1 = arith.constant 0 : index
    %3 = vector.load %arg6[%c0, %c0_1] : memref<8x128xf32, #tpu.memory_space<vmem>>, vector<8x128xf32>
    %c0_2 = arith.constant 0 : index
    %c0_3 = arith.constant 0 : index
    %4 = vector.load %arg2[%c0_2, %c0_3] : memref<8x32xf32, #tpu.memory_space<vmem>>, vector<8x32xf32>
    %c0_4 = arith.constant 0 : index
    %c0_5 = arith.constant 0 : index
    %5 = vector.load %arg3[%c0_4, %c0_5] : memref<32x128xf32, #tpu.memory_space<vmem>>, vector<32x128xf32>
    %cst = arith.constant dense<0.000000e+00> : vector<8x128xf32>
    %6 = tpu.matmul %4, %5, %cst {dimension_numbers = #tpu.dot_dimension_numbers<[1], [0], [0], [1], [0, 0, 1, 1], [], []>} : vector<8x32xf32>, vector<32x128xf32>, vector<8x128xf32> -> vector<8x128xf32>
    %7 = arith.addf %3, %6 : vector<8x128xf32>
    %c0_6 = arith.constant 0 : index
    %c0_7 = arith.constant 0 : index
    %8 = vector.load %arg6[%c0_6, %c0_7] : memref<8x128xf32, #tpu.memory_space<vmem>>, vector<8x128xf32>
    tpu.vector_store %arg6[%c0_6, %c0_7], %7 {strides = array<i32>} : memref<8x128xf32, #tpu.memory_space<vmem>>, vector<8x128xf32>,
    %c0_i32_8 = arith.constant 0 : i32
    %9 = arith.cmpi eq, %arg1, %c0_i32_8 : i32
    %10 = arith.extui %9 : i1 to i32
    %c0_i32_9 = arith.constant 0 : i32
    %11 = arith.cmpi ne, %10, %c0_i32_9 : i32
    scf.if %11 {
      %c0_10 = arith.constant 0 : index
      %c0_11 = arith.constant 0 : index
      %12 = vector.load %arg6[%c0_10, %c0_11] : memref<8x128xf32, #tpu.memory_space<vmem>>, vector<8x128xf32>
      %c0_12 = arith.constant 0 : index
      %c0_13 = arith.constant 0 : index
      %13 = vector.load %arg4[%c0_12, %c0_13] : memref<1x128xf32, #tpu.memory_space<vmem>>, vector<1x128xf32>
      %14 = vector.broadcast %13 : vector<1x128xf32> to vector<8x128xf32>
      %15 = arith.addf %12, %14 : vector<8x128xf32>
      %c0_14 = arith.constant 0 : index
      %c0_15 = arith.constant 0 : index
      %16 = vector.load %arg5[%c0_14, %c0_15] : memref<8x128xf32, #tpu.memory_space<vmem>>, vector<8x128xf32>
      tpu.vector_store %arg5[%c0_14, %c0_15], %15 {strides = array<i32>} : memref<8x128xf32, #tpu.memory_space<vmem>>, vector<8x128xf32>,
    } else {
    }
    return
  }
  func.func @transform_0(%arg0: i32, %arg1: i32) -> (i32, i32) {
    %c0_i32 = arith.constant 0 : i32
    return %arg0, %arg1 : i32, i32
  }
  func.func @transform_1(%arg0: i32, %arg1: i32) -> (i32, i32) {
    %c0_i32 = arith.constant 0 : i32
    %c0_i32_0 = arith.constant 0 : i32
    return %arg1, %c0_i32 : i32, i32
  }
  func.func @transform_2(%arg0: i32, %arg1: i32) -> (i32, i32) {
    %c0_i32 = arith.constant 0 : i32
    %c0_i32_0 = arith.constant 0 : i32
    %c0_i32_1 = arith.constant 0 : i32
    return %c0_i32, %c0_i32_0 : i32, i32
  }
  func.func @transform_3(%arg0: i32, %arg1: i32) -> (i32, i32) {
    %c0_i32 = arith.constant 0 : i32
    %c0_i32_0 = arith.constant 0 : i32
    return %arg0, %c0_i32 : i32, i32
  }
}

</mosaic_0001>

<bundles_post_ra>
// kernel: linear_prober.1
= control target key start
LH: loop header
LB: loop body
LE: loop exit
PB: predicated region body
PF: predicated region fallthrough
CT: control target
= control target key end

     0   :  { %v172_v1 = vmov 0.0   ;;  %vm173_vm0 = vmmov 0   ;;  %s216_s0 = inlined_call_operand.vmem [shape: f32[8,32], index: 0, kind: input, shape index: {}]   ;;  %s217_s1 = inlined_call_operand.vmem [shape: f32[32,128], index: 1, kind: input, shape index: {}]   ;;  %s218_s2 = inlined_call_operand.vmem [shape: f32[1,128], index: 2, kind: input, shape index: {}]   ;;  %s219_s3 = inlined_call_operand.hbm [shape: f32[8,128], index: 3, kind: output, shape index: {}]  }
   0x1   :  { %v25_v0 = vld [vmem:[%s217_s1 + $0x18] sm:$0xff]  ;;  %136 = vmatprep.subr.mxu0 %v172_v1  ;;  %v24_v2 = vld [vmem:[%s217_s1 + $0x10] sm:$0xff]  ;;  %144 = vmatprep.mubr.msk.f32.mxu0 %vm173_vm0, %v172_v1 }
   0x2   :  { %8 = vsyncpa [#allocation4], 0  ;;  %137 = vmatpush3.msra.mxu0 %v25_v0  ;;  %v23_v3 = vld [vmem:[%s217_s1 + $0x8] sm:$0xff]  ;;  %v22_v4 = vld [vmem:[%s217_s1] sm:$0xff]  ;;  %vm26_vm1 = vcmask 261120   ;;  %s174_s24 = smov [#allocation3]  }
   0x3   :  { %138 = vmatprep.subr.mxu0 %v172_v1  ;;  %v21_v5 = vld [vmem:[%s216_s0] sm:$0xff]  ;;  %s121_s25 = sshll.u32 %s174_s24, 4  ;;  %s122_s25 = int_to_ptr.vmem [resolvable:$true] %s121_s25 }
   0x4   :  { %139 = vmatpush3.msra.mxu0 %v24_v2  ;;  %v130_v6 = vld [vmem:[%s218_s2] ss:$0 sm:$0xff]  ;;  %s150_s1 = scalar_lea.vmem %s122_s25, 128  ;;  %p155_p1 = scmp.lt.s32.totalorder %s122_s25, %s122_s25 }
   0x5   :  { %140 = vmatprep.subr.mxu0 %v172_v1  ;;  %p151_p0 = scmp.ne.s32.totalorder %s122_s25, %s150_s1  ;;  %p156_p2 = scmp.lt.s32.totalorder %s150_s1, %s150_s1 }
   0x6   :  { %141 = vmatpush3.msra.mxu0 %v23_v3 }
   0x7   :  { %142 = vmatprep.subr.mxu0 %v172_v1  ;;  %p157_p3 = por %p156_p2, %p155_p1 }
   0x8   :  { %143 = vmatpush3.msra.mxu0 %v22_v4 }
   0x9   :  { %145 = vmatmul.mubr.msk.f32.vlgmr.msra.gmra.mxu0 %vm26_vm1, %v21_v5  ;;  %p158_p4 = pnand %p157_p3, %p151_p0 }
  0xc9   :  { %v96_v7 = vpop.f32.mrf.mxu0 }
  0xca   :  { %v113_v8 = vadd.f32 %v130_v6, %v96_v7 }
  0xcb   :  { %v146_v9 = vpop.f32.mrf.mxu0 }
  0xcc   :  { %114 = vst [vmem:[#allocation3] sm:$0xff] %v113_v8 }
  0xcd   :  { %161 = shalt.err (!%p158_p4)
}
  0xce   :  { %124 = dma.vmem_to_hbm [thread:$0]  %s122_s25, 128, %s219_s3, [#allocation4]  }
  0xcf   :  { %170 = dma.done.wait [#allocation4], 128  }
  0xd0   :  { %171 = vsyncadd [#allocation4], 4294967168 }
  0xd1   :  { %128 = vsyncpa [#allocation4], 1 }

</bundles_post_ra>
